<compile_context>
chip_gen: v7x
topology: tpu7x:2x2x1
jax: 0.10.0
libtpu: 0.0.40
codegen_flags: <defaults>
</compile_context>

<pallas_src>
import functools

import jax
import jax.numpy as jnp
from jax import lax
from jax.experimental import pallas as pl
from jax.experimental.pallas import tpu as pltpu

_LANE = 128


def _round_up(n: int, m: int) -> int:
    return ((n + m - 1) // m) * m


def _vmem_budget_bytes():
    """(planning budget, mosaic vmem_limit_bytes), derived from the chip."""
    try:
        cap = int(pltpu.get_tpu_info().vmem_capacity_bytes)
    except Exception:
        cap = 0
    if cap <= 0:
        cap = 64 * 1024 * 1024                      # conservative: v7x per-TC VMEM
    cap = max(32 * 1024 * 1024, min(cap, 128 * 1024 * 1024))
    return int(cap * 0.75), int(cap * 0.85)


def _probe_copy_kernel(x_ref, o_ref):
    o_ref[...] = x_ref[...]


@functools.lru_cache(maxsize=None)
def _single_buffer_supported() -> bool:
    """Probe once whether pipeline_mode=pl.Buffered(1) compiles & runs here."""
    try:
        x = jnp.arange(8 * 128, dtype=jnp.float32).reshape(8, 128)
        y = pl.pallas_call(
            _probe_copy_kernel,
            out_shape=jax.ShapeDtypeStruct((8, 128), jnp.float32),
            grid=(1,),
            in_specs=[pl.BlockSpec((8, 128), lambda i: (0, 0),
                                   pipeline_mode=pl.Buffered(1))],
            out_specs=pl.BlockSpec((8, 128), lambda i: (0, 0)),
        )(x)
        return bool(jnp.array_equal(jax.block_until_ready(y), x))
    except Exception:
        return False


def _batch_tile_bytes(tb, inp_p, t_out, x_bytes, o_bytes):
    """VMEM working set of one batch tile (excluding the W / bias blocks)."""
    return (2 * tb * inp_p * x_bytes        # x block (double-buffered)
            + 2 * tb * t_out * o_bytes      # enc output block (double-buffered)
            + 2 * tb * inp_p * o_bytes      # rec output block (double-buffered)
            + tb * inp_p * 4)               # f32 reconstruction accumulator


def prepare_tied_ae_params(w, b=None, *, compute_dtype=jnp.bfloat16):
    """Pad + cast the tied weights once (hoisted out of the per-call path)."""
    out, inp = w.shape
    compute_dtype = jnp.dtype(compute_dtype)
    cbytes = compute_dtype.itemsize
    inp_p = _round_up(inp, _LANE)
    out_p0 = _round_up(out, _LANE)
    budget, _ = _vmem_budget_bytes()

    sb_ok = _single_buffer_supported()
    n_pinned_buf = 1 if sb_ok else 2
    # Worst-case minimal batch-tile pipeline that must coexist with W.
    min_pipe_full = _batch_tile_bytes(16, inp_p, out_p0, 4, 4)

    if n_pinned_buf * out_p0 * (inp_p * cbytes + 4) + min_pipe_full <= budget:
        # Whole W stays VMEM-resident for the whole grid (preferred path).
        t_out, out_p, pinned = out_p0, out_p0, True
    else:
        # Fallback (large layers, esp. v7x 64 MiB/TC): stream W in out-tiles
        # along a trailing reduction axis; accumulate rec in VMEM scratch.
        pinned = False
        t_out = _LANE
        for cand in (2048, 1024, 512, 256):
            if cand < out_p0 and (2 * cand * (inp_p * cbytes + 4)
                                  + _batch_tile_bytes(16, inp_p, cand, 4, 4)
                                  <= budget):
                t_out = cand
                break
        out_p = _round_up(out_p0, t_out)
        # TODO(synk): if inp is so large that even a (16, inp_p) tile overflows
        # VMEM, the contraction (inp) axis would also need tiling.

    # Zero padding keeps the math exact: padded W rows/cols and bias are zero,
    # so padded enc lanes are zero and contribute nothing to rec.
    w_p = jnp.zeros((out_p, inp_p), compute_dtype).at[:out, :inp].set(
        w.astype(compute_dtype))
    if b is None:
        b = jnp.zeros((out,), jnp.float32)
    b_p = jnp.zeros((1, out_p), jnp.float32).at[0, :out].set(
        b.astype(jnp.float32))

    meta = dict(inp=inp, out=out, t_out=t_out, pinned=pinned,
                single_buf=bool(pinned and sb_ok), compute_dtype=compute_dtype)
    return w_p, b_p, meta


def _tied_ae_kernel(x_ref, w_ref, b_ref, enc_ref, rec_ref, *acc, tiled_w):
    w = w_ref[...]                             # (t_out, inp_p) compute dtype
    x = x_ref[...].astype(w.dtype)             # (tb, inp_p)

    # Encoder: x @ W_j.T without materializing the transpose -- contract the
    # lane (last) dim of BOTH operands on the MXU, accumulate in f32.
    enc = lax.dot_general(x, w, (((1,), (1,)), ((), ())),
                          preferred_element_type=jnp.float32)
    enc = enc + b_ref[...]                     # f32 bias add (VPU)
    enc_ref[...] = enc.astype(enc_ref.dtype)

    # Tied decoder: enc_j @ W_j, reusing the same VMEM-resident W block.
    part = lax.dot_general(enc.astype(w.dtype), w, (((1,), (0,)), ((), ())),
                           preferred_element_type=jnp.float32)

    if not tiled_w:
        rec_ref[...] = part.astype(rec_ref.dtype)
    else:
        acc_ref, = acc
        j = pl.program_id(1)

        @pl.when(j == 0)
        def _():
            acc_ref[...] = part

        @pl.when(j != 0)
        def _():
            acc_ref[...] = acc_ref[...] + part

        @pl.when(j == pl.num_programs(1) - 1)
        def _():
            rec_ref[...] = acc_ref[...].astype(rec_ref.dtype)


@functools.partial(
    jax.jit,
    static_argnames=("inp", "out", "t_out", "pinned", "single_buf",
                     "compute_dtype", "out_dtype"))
def _tied_ae_forward(x, w_p, b_p, *, inp, out, t_out, pinned, single_buf,
                     compute_dtype, out_dtype):
    B = x.shape[0]
    out_p, inp_p = w_p.shape
    cbytes = jnp.dtype(compute_dtype).itemsize
    obytes = jnp.dtype(out_dtype).itemsize

    # x only needs padding on the (contracted) feature dim and for tiny
    # batches; ragged batch edges are masked by Pallas on write.
    needs_x_pad = (inp_p != inp) or (B < 8)
    if needs_x_pad:
        Bx = _round_up(max(B, 8), 8)
        x_in = jnp.zeros((Bx, inp_p), compute_dtype).at[:B, :inp].set(
            x.astype(compute_dtype))
        xbytes = cbytes
    else:
        Bx, x_in, xbytes = B, x, x.dtype.itemsize

    budget, vmem_limit = _vmem_budget_bytes()
    n_w_buf = 1 if single_buf else 2
    avail = budget - n_w_buf * t_out * (inp_p * cbytes + 4)

    # Largest batch tile (bf16-sublane friendly sizes) that fits the budget.
    tb = 8
    for cand in (1024, 512, 256, 128, 64, 32, 16, 8):
        if cand <= Bx and _batch_tile_bytes(cand, inp_p, t_out, xbytes,
                                            obytes) <= avail:
            tb = cand
            break
    # Keep >= 2 batch grid steps so v7x's second TensorCore gets work.
    while pl.cdiv(Bx, tb) < 2 and tb >= 32:
        tb //= 2

    n_bt = pl.cdiv(Bx, tb)
    n_ot = out_p // t_out
    grid = (n_bt, n_ot)

    if single_buf:
        # W / bias are pinned: single-buffer them so they occupy half the VMEM.
        w_spec = pl.BlockSpec((t_out, inp_p), lambda i, j: (j, 0),
                              pipeline_mode=pl.Buffered(1))
        b_spec = pl.BlockSpec((1, t_out), lambda i, j: (0, j),
                              pipeline_mode=pl.Buffered(1))
    else:
        w_spec = pl.BlockSpec((t_out, inp_p), lambda i, j: (j, 0))
        b_spec = pl.BlockSpec((1, t_out), lambda i, j: (0, j))

    scratch = [] if pinned else [pltpu.VMEM((tb, inp_p), jnp.float32)]
    kernel = functools.partial(_tied_ae_kernel, tiled_w=not pinned)

    flops = 4 * B * inp * out                   # two B x inp x out matmuls
    bytes_accessed = (
        Bx * inp_p * xbytes                                   # x
        + (1 if pinned else n_bt) * out_p * inp_p * cbytes    # W
        + out_p * 4                                           # bias
        + Bx * out_p * obytes                                 # enc
        + Bx * inp_p * obytes)                                # rec

    enc_p, rec_p = pl.pallas_call(
        kernel,
        out_shape=(jax.ShapeDtypeStruct((Bx, out_p), out_dtype),
                   jax.ShapeDtypeStruct((Bx, inp_p), out_dtype)),
        grid=grid,
        in_specs=[pl.BlockSpec((tb, inp_p), lambda i, j: (i, 0)),
                  w_spec, b_spec],
        out_specs=(pl.BlockSpec((tb, t_out), lambda i, j: (i, j)),
                   pl.BlockSpec((tb, inp_p), lambda i, j: (i, 0))),
        scratch_shapes=scratch,
        compiler_params=pltpu.CompilerParams(
            dimension_semantics=("parallel", "arbitrary"),
            vmem_limit_bytes=vmem_limit),
        cost_estimate=pl.CostEstimate(flops=flops, transcendentals=0,
                                      bytes_accessed=bytes_accessed),
    )(x_in, w_p, b_p)

    return enc_p[:B, :out], rec_p[:B, :inp]


def tied_autoencoder_forward(x, params, *, out_dtype=None):
    """Forward of MixedApproachTiedAutoEncoder -> (encoded, reconstructed)."""
    w_p, b_p, meta = params
    out_dtype = jnp.dtype(x.dtype if out_dtype is None else out_dtype)
    return _tied_ae_forward(
        x, w_p, b_p,
        inp=meta["inp"], out=meta["out"], t_out=meta["t_out"],
        pinned=meta["pinned"], single_buf=meta["single_buf"],
        compute_dtype=meta["compute_dtype"], out_dtype=out_dtype)


if __name__ == "__main__":
    key = jax.random.PRNGKey(0)
    kx, kw, kb = jax.random.split(key, 3)

    batch, inp, out = 8, 64, 32   # small shapes consistent with Linear(inp, out)

    # Deterministic init mimicking nn.Linear's uniform(-1/sqrt(inp), 1/sqrt(inp)).
    bound = 1.0 / (inp ** 0.5)
    w = jax.random.uniform(kw, (out, inp), jnp.float32, -bound, bound)
    b = jax.random.uniform(kb, (out,), jnp.float32, -bound, bound)
    x = jax.random.normal(kx, (batch, inp), jnp.float32)

    params = prepare_tied_ae_params(w, b)             # W pad/cast hoisted, done once
    enc, rec = tied_autoencoder_forward(x, params)
    jax.block_until_ready((enc, rec))

    # f32 reference of the PyTorch forward.
    enc_ref = x @ w.T + b
    rec_ref = enc_ref @ w

    assert enc.shape == (batch, out) and rec.shape == (batch, inp)
    assert enc.dtype == x.dtype and rec.dtype == x.dtype
    # Operands are bf16 on the MXU (f32 accumulate) -> relaxed tolerance vs f32 ref.
    assert jnp.allclose(enc, enc_ref, atol=5e-2, rtol=5e-2), "encoder mismatch"
    assert jnp.allclose(rec, rec_ref, atol=5e-2, rtol=5e-2), "decoder mismatch"

    print("KERNEL_OK")
</pallas_src>

<mosaic_0001>
module attributes {stable_mosaic.version = 11 : i64} {
  func.func @_probe_copy_kernel(%arg0: i32, %arg1: memref<8x128xf32, #tpu.memory_space<vmem>>, %arg2: memref<8x128xf32, #tpu.memory_space<vmem>>) attributes {dimension_semantics = [#tpu.dimension_semantics<arbitrary>], iteration_bounds = array<i64: 1>, scalar_prefetch = 0 : i64, scratch_operands = 0 : i64, tpu.core_type = #tpu.core_type<tc>, window_params = [{pipeline_mode = #tpu.pipeline_mode<synchronous>, transform_indices = @transform_0, window_bounds = array<i64: 8, 128>}, {pipeline_mode = #tpu.pipeline_mode<synchronous>, transform_indices = @transform_1, window_bounds = array<i64: 8, 128>}]} {
    %c0 = arith.constant 0 : index
    %c0_0 = arith.constant 0 : index
    %0 = vector.load %arg1[%c0, %c0_0] : memref<8x128xf32, #tpu.memory_space<vmem>>, vector<8x128xf32>
    %c0_1 = arith.constant 0 : index
    %c0_2 = arith.constant 0 : index
    %1 = vector.load %arg2[%c0_1, %c0_2] : memref<8x128xf32, #tpu.memory_space<vmem>>, vector<8x128xf32>
    tpu.vector_store %arg2[%c0_1, %c0_2], %0 {strides = array<i32>} : memref<8x128xf32, #tpu.memory_space<vmem>>, vector<8x128xf32>,
    return
  }
  func.func @transform_0(%arg0: i32) -> (i32, i32) {
    %c0_i32 = arith.constant 0 : i32
    %c0_i32_0 = arith.constant 0 : i32
    %c0_i32_1 = arith.constant 0 : i32
    return %c0_i32, %c0_i32_0 : i32, i32
  }
  func.func @transform_1(%arg0: i32) -> (i32, i32) {
    %c0_i32 = arith.constant 0 : i32
    %c0_i32_0 = arith.constant 0 : i32
    %c0_i32_1 = arith.constant 0 : i32
    return %c0_i32, %c0_i32_0 : i32, i32
  }
}

module attributes {stable_mosaic.version = 11 : i64} {
  func.func @_tied_ae_kernel(%arg0: i32, %arg1: i32, %arg2: memref<8x128xbf16, #tpu.memory_space<vmem>>, %arg3: memref<128x128xbf16, #tpu.memory_space<vmem>>, %arg4: memref<1x128xf32, #tpu.memory_space<vmem>>, %arg5: memref<8x128xf32, #tpu.memory_space<vmem>>, %arg6: memref<8x128xf32, #tpu.memory_space<vmem>>) attributes {dimension_semantics = [#tpu.dimension_semantics<parallel>, #tpu.dimension_semantics<arbitrary>], iteration_bounds = array<i64: 1, 1>, scalar_prefetch = 0 : i64, scratch_operands = 0 : i64, tpu.core_type = #tpu.core_type<tc>, window_params = [{transform_indices = @transform_0, window_bounds = array<i64: 8, 128>}, {transform_indices = @transform_1, window_bounds = array<i64: 128, 128>}, {transform_indices = @transform_2, window_bounds = array<i64: 1, 128>}, {transform_indices = @transform_3, window_bounds = array<i64: 8, 128>}, {transform_indices = @transform_4, window_bounds = array<i64: 8, 128>}]} {
    %c0 = arith.constant 0 : index
    %c0_0 = arith.constant 0 : index
    %0 = vector.load %arg3[%c0, %c0_0] : memref<128x128xbf16, #tpu.memory_space<vmem>>, vector<128x128xbf16>
    %c0_1 = arith.constant 0 : index
    %c0_2 = arith.constant 0 : index
    %1 = vector.load %arg2[%c0_1, %c0_2] : memref<8x128xbf16, #tpu.memory_space<vmem>>, vector<8x128xbf16>
    %cst = arith.constant dense<0.000000e+00> : vector<8x128xf32>
    %2 = tpu.matmul %1, %0, %cst {dimension_numbers = #tpu.dot_dimension_numbers<[1], [1], [0], [0], [0, 0, 1, 0], [], []>} : vector<8x128xbf16>, vector<128x128xbf16>, vector<8x128xf32> -> vector<8x128xf32>
    %c0_3 = arith.constant 0 : index
    %c0_4 = arith.constant 0 : index
    %3 = vector.load %arg4[%c0_3, %c0_4] : memref<1x128xf32, #tpu.memory_space<vmem>>, vector<1x128xf32>
    %4 = vector.broadcast %3 : vector<1x128xf32> to vector<8x128xf32>
    %5 = arith.addf %2, %4 : vector<8x128xf32>
    %c0_5 = arith.constant 0 : index
    %c0_6 = arith.constant 0 : index
    %6 = vector.load %arg5[%c0_5, %c0_6] : memref<8x128xf32, #tpu.memory_space<vmem>>, vector<8x128xf32>
    tpu.vector_store %arg5[%c0_5, %c0_6], %5 {strides = array<i32>} : memref<8x128xf32, #tpu.memory_space<vmem>>, vector<8x128xf32>,
    %7 = arith.truncf %5 : vector<8x128xf32> to vector<8x128xbf16>
    %cst_7 = arith.constant dense<0.000000e+00> : vector<8x128xf32>
    %8 = tpu.matmul %7, %0, %cst_7 {dimension_numbers = #tpu.dot_dimension_numbers<[1], [0], [0], [1], [0, 0, 1, 1], [], []>} : vector<8x128xbf16>, vector<128x128xbf16>, vector<8x128xf32> -> vector<8x128xf32>
    %c0_8 = arith.constant 0 : index
    %c0_9 = arith.constant 0 : index
    %9 = vector.load %arg6[%c0_8, %c0_9] : memref<8x128xf32, #tpu.memory_space<vmem>>, vector<8x128xf32>
    tpu.vector_store %arg6[%c0_8, %c0_9], %8 {strides = array<i32>} : memref<8x128xf32, #tpu.memory_space<vmem>>, vector<8x128xf32>,
    return
  }
  func.func @transform_0(%arg0: i32, %arg1: i32) -> (i32, i32) {
    %c0_i32 = arith.constant 0 : i32
    %c0_i32_0 = arith.constant 0 : i32
    return %arg0, %c0_i32 : i32, i32
  }
  func.func @transform_1(%arg0: i32, %arg1: i32) -> (i32, i32) {
    %c0_i32 = arith.constant 0 : i32
    %c0_i32_0 = arith.constant 0 : i32
    return %arg1, %c0_i32 : i32, i32
  }
  func.func @transform_2(%arg0: i32, %arg1: i32) -> (i32, i32) {
    %c0_i32 = arith.constant 0 : i32
    %c0_i32_0 = arith.constant 0 : i32
    return %c0_i32, %arg1 : i32, i32
  }
  func.func @transform_3(%arg0: i32, %arg1: i32) -> (i32, i32) {
    %c0_i32 = arith.constant 0 : i32
    return %arg0, %arg1 : i32, i32
  }
  func.func @transform_4(%arg0: i32, %arg1: i32) -> (i32, i32) {
    %c0_i32 = arith.constant 0 : i32
    %c0_i32_0 = arith.constant 0 : i32
    return %arg0, %c0_i32 : i32, i32
  }
}

</mosaic_0001>

<bundles_post_ra>
// kernel: tpu_custom_call.1
= control target key start
LH: loop header
LB: loop body
LE: loop exit
PB: predicated region body
PF: predicated region fallthrough
CT: control target
= control target key end

     0   :  { %6 = vsyncpa [#allocation3], 0  ;;  %s124_s0 = inlined_call_operand.hbm [shape: f32[8,128], index: 0, kind: input, shape index: {}]   ;;  %s125_s1 = inlined_call_operand.hbm [shape: f32[8,128], index: 1, kind: output, shape index: {}]  }
   0x1   :  { %7 = vsyncpa [#allocation4], 0  ;;  %s88_s6 = smov [#allocation2]   ;;  %s40_s10 = scalar_lea.hbm %s124_s0, 128 }
   0x2   :  { %s14_s7 = sshll.u32 %s88_s6, 4  ;;  %p41_p0 = scmp.ne.s32.totalorder %s124_s0, %s40_s10  ;;  %s15_s7 = int_to_ptr.vmem [resolvable:$true] %s14_s7 }
   0x3   :  { %p44_p1 = scmp.lt.u32.totalorder %s40_s10, %s124_s0 }
   0x5   :  { %p46_p2 = pnand %p44_p1, %p41_p0 }
   0x7   :  { %49 = shalt.err (!%p46_p2)
}
   0x8   :  { %s50_s15 = scalar_lea.vmem %s15_s7, 128  ;;  %p55_p4 = scmp.lt.s32.totalorder %s15_s7, %s15_s7 }
   0x9   :  { %p51_p3 = scmp.ne.s32.totalorder %s15_s7, %s50_s15  ;;  %p56_p5 = scmp.lt.s32.totalorder %s50_s15, %s50_s15 }
   0xb   :  { %p57_p6 = por %p56_p5, %p55_p4 }
   0xd   :  { %p58_p7 = pnand %p57_p6, %p51_p3 }
   0xf   :  { %61 = shalt.err (!%p58_p7)
}
  0x10   :  { %17 = dma.hbm_to_vmem [thread:$0]  %s124_s0, 128, %s15_s7, [#allocation3]  }
  0x11   :  { %84 = dma.done.wait [#allocation3], 128  }
  0x12   :  { %85 = vsyncadd [#allocation3], 4294967168  ;;  %s89_s18 = smov [#allocation5]   ;;  %v21_v0 = vld [vmem:[#allocation2] sm:$0xff] }
  0x13   :  { %s29_s19 = sshll.u32 %s89_s18, 4  ;;  %22 = vst [vmem:[#allocation5] sm:$0xff] %v21_v0  ;;  %s30_s19 = int_to_ptr.vmem [resolvable:$true] %s29_s19 }
  0x14   :  { %s62_s20 = scalar_lea.vmem %s30_s19, 128  ;;  %p67_p9 = scmp.lt.s32.totalorder %s30_s19, %s30_s19 }
  0x15   :  { %p63_p8 = scmp.ne.s32.totalorder %s30_s19, %s62_s20  ;;  %p68_p10 = scmp.lt.s32.totalorder %s62_s20, %s62_s20 }
  0x17   :  { %p69_p11 = por %p68_p10, %p67_p9 }
  0x19   :  { %p70_p12 = pnand %p69_p11, %p63_p8 }
  0x1b   :  { %73 = shalt.err (!%p70_p12)
}
  0x1c   :  { %s74_s23 = scalar_lea.hbm %s125_s1, 128 }
  0x1d   :  { %p75_p13 = scmp.ne.s32.totalorder %s125_s1, %s74_s23  ;;  %p78_p0 = scmp.lt.u32.totalorder %s74_s23, %s125_s1 }
  0x1f   :  { %p80_p1 = pnand %p78_p0, %p75_p13 }
  0x21   :  { %83 = shalt.err (!%p80_p1)
}
  0x22   :  { %32 = dma.vmem_to_hbm [thread:$0]  %s30_s19, 128, %s125_s1, [#allocation4]  }
  0x23   :  { %86 = dma.done.wait [#allocation4], 128  }
  0x24   :  { %87 = vsyncadd [#allocation4], 4294967168 }
  0x25   :  { %36 = vsyncpa [#allocation3], 1 }
  0x26   :  { %37 = vsyncpa [#allocation4], 1 }

// kernel: _tied_ae_forward.1
= control target key start
LH: loop header
LB: loop body
LE: loop exit
PB: predicated region body
PF: predicated region fallthrough
CT: control target
= control target key end

     0   :  { %10 = vsyncpa [#allocation3], 0  ;;  %s445_s0 = inlined_call_operand.vmem [shape: bf16[8,128], index: 0, kind: input, shape index: {}]   ;;  %s446_s1 = inlined_call_operand.hbm [shape: bf16[128,128], index: 1, kind: input, shape index: {}]   ;;  %s447_s2 = inlined_call_operand.vmem [shape: f32[1,128], index: 2, kind: input, shape index: {}]   ;;  %s448_s3 = inlined_call_operand.hbm [shape: f32[8,128], index: 3, kind: output, shape index: {0}]   ;;  %s449_s4 = inlined_call_operand.hbm [shape: f32[8,128], index: 4, kind: output, shape index: {1}]  }
   0x1   :  { %11 = vsyncpa [#allocation4], 0 }
   0x2   :  { %12 = vsyncpa [#allocation7], 0  ;;  %s371_s15 = smov [#allocation2]   ;;  %s299_s19 = scalar_lea.hbm %s446_s1, 1024 }
   0x3   :  { %s20_s16 = sshll.u32 %s371_s15, 4  ;;  %p300_p0 = scmp.ne.s32.totalorder %s446_s1, %s299_s19  ;;  %s21_s16 = int_to_ptr.vmem [resolvable:$true] %s20_s16 }
   0x4   :  { %p303_p1 = scmp.lt.u32.totalorder %s299_s19, %s446_s1 }
   0x6   :  { %p305_p2 = pnand %p303_p1, %p300_p0 }
   0x8   :  { %308 = shalt.err (!%p305_p2)
}
   0x9   :  { %s309_s24 = scalar_lea.vmem %s21_s16, 1024  ;;  %p314_p4 = scmp.lt.s32.totalorder %s21_s16, %s21_s16 }
   0xa   :  { %p310_p3 = scmp.ne.s32.totalorder %s21_s16, %s309_s24  ;;  %p315_p5 = scmp.lt.s32.totalorder %s309_s24, %s309_s24 }
   0xc   :  { %p316_p6 = por %p315_p5, %p314_p4 }
   0xe   :  { %p317_p7 = pnand %p316_p6, %p310_p3 }
  0x10   :  { %320 = shalt.err (!%p317_p7)
}
  0x11   :  { %s372_s25 = smov 64   ;;  %s373_s26 = smov 4  }
  0x12   :  { %26 = dma.hbm_to_vmem [thread:$0]  %s446_s1, 1024, %s21_s16, [#allocation3], %s372_s25, %s372_s25, %s373_s26  }
  0x13   :  { %365 = dma.done.wait [#allocation3], 1024  }
  0x14   :  { %366 = vsyncadd [#allocation3], 4294966272  ;;  %v374_v0 = vmov 0.0   ;;  %vm375_vm0 = vmmov 0   ;;  %v291_v1 = vld [vmem:[#allocation2] sm:$0xff]   ;;  %v292_v2 = vld [vmem:[#allocation2 + $0x8] sm:$0xff]  }
  0x15   :  { %244 = vmatprep.subr.bf16.mxu0 %v374_v0  ;;  %260 = vmatprep.mubr.msk.bf16.mxu0 %vm375_vm0, %v374_v0  ;;  %v293_v3 = vld [vmem:[#allocation2 + $0x10] sm:$0xff]   ;;  %v294_v4 = vld [vmem:[#allocation2 + $0x18] sm:$0xff]   ;;  %v295_v5 = vld [vmem:[#allocation2 + $0x20] sm:$0xff]   ;;  %s376_s6 = smov [#allocation5]  }
  0x16   :  { %264 = vmatprep.subr.bf16.mxu1 %v374_v0  ;;  %280 = vmatprep.mubr.msk.bf16.mxu1 %vm375_vm0, %v374_v0  ;;  %v296_v6 = vld [vmem:[#allocation2 + $0x28] sm:$0xff]   ;;  %v297_v7 = vld [vmem:[#allocation2 + $0x30] sm:$0xff]   ;;  %v298_v8 = vld [vmem:[#allocation2 + $0x38] sm:$0xff]   ;;  %s194_s7 = sshll.u32 %s376_s6, 4  ;;  %s195_s7 = int_to_ptr.vmem [resolvable:$true] %s194_s7 }
  0x17   :  { %245 = vmatpush3.bf16.xpose.msra.mxu0 %v291_v1  ;;  %265 = vmatpush3.bf16.msra.mxu1 %v291_v1  ;;  %v49_v9 = vld [vmem:[%s445_s0] sm:$0xf]  ;;  %s321_s8 = scalar_lea.vmem %s195_s7, 128  ;;  %p326_p9 = scmp.lt.s32.totalorder %s195_s7, %s195_s7 }
  0x18   :  { %246 = vmatprep.subr.bf16.mxu0 %v374_v0  ;;  %266 = vmatprep.subr.bf16.mxu1 %v374_v0  ;;  %v217_v10 = vld [vmem:[%s447_s2] ss:$0 sm:$0xff]  ;;  %p322_p8 = scmp.ne.s32.totalorder %s195_s7, %s321_s8  ;;  %p327_p10 = scmp.lt.s32.totalorder %s321_s8, %s321_s8 }
  0x1a   :  { %p328_p11 = por %p327_p10, %p326_p9 }
  0x1b   :  { %267 = vmatpush3.bf16.msra.mxu1 %v292_v2 }
  0x1c   :  { %268 = vmatprep.subr.bf16.mxu1 %v374_v0  ;;  %p329_p12 = pnand %p328_p11, %p322_p8 }
  0x1f   :  { %247 = vmatpush3.bf16.xpose.msra.mxu0 %v292_v2  ;;  %269 = vmatpush3.bf16.msra.mxu1 %v293_v3 }
  0x20   :  { %248 = vmatprep.subr.bf16.mxu0 %v374_v0  ;;  %270 = vmatprep.subr.bf16.mxu1 %v374_v0 }
  0x23   :  { %271 = vmatpush3.bf16.msra.mxu1 %v294_v4 }
  0x24   :  { %272 = vmatprep.subr.bf16.mxu1 %v374_v0 }
  0x27   :  { %249 = vmatpush3.bf16.xpose.msra.mxu0 %v293_v3  ;;  %273 = vmatpush3.bf16.msra.mxu1 %v295_v5 }
  0x28   :  { %250 = vmatprep.subr.bf16.mxu0 %v374_v0  ;;  %274 = vmatprep.subr.bf16.mxu1 %v374_v0 }
  0x2b   :  { %275 = vmatpush3.bf16.msra.mxu1 %v296_v6 }
  0x2c   :  { %276 = vmatprep.subr.bf16.mxu1 %v374_v0 }
  0x2f   :  { %251 = vmatpush3.bf16.xpose.msra.mxu0 %v294_v4  ;;  %277 = vmatpush3.bf16.msra.mxu1 %v297_v7 }
  0x30   :  { %252 = vmatprep.subr.bf16.mxu0 %v374_v0  ;;  %278 = vmatprep.subr.bf16.mxu1 %v374_v0 }
  0x33   :  { %279 = vmatpush3.bf16.msra.mxu1 %v298_v8 }
  0x37   :  { %253 = vmatpush3.bf16.xpose.msra.mxu0 %v295_v5 }
  0x38   :  { %254 = vmatprep.subr.bf16.mxu0 %v374_v0 }
  0x3f   :  { %255 = vmatpush3.bf16.xpose.msra.mxu0 %v296_v6 }
  0x40   :  { %256 = vmatprep.subr.bf16.mxu0 %v374_v0 }
  0x47   :  { %257 = vmatpush3.bf16.xpose.msra.mxu0 %v297_v7 }
  0x48   :  { %258 = vmatprep.subr.bf16.mxu0 %v374_v0 }
  0x4f   :  { %259 = vmatpush3.bf16.xpose.msra.mxu0 %v298_v8 }
  0x56   :  { %261 = vmatmul.mubr.bf16.vlgmr.msra.gmra.mrb[0].mxu0 %v49_v9 }
 0x129   :  { %v139_v11 = vpop.f32.mrb[0].mxu0 }
 0x12a   :  { %v140_v12 = vadd.f32 %v217_v10, %v139_v11  ;;  %v262_v13 = vpop.f32.mrb[1].mxu0 }
 0x12b   :  { %v142_v14 = vpop.f32.mrb[2].mxu0 }
 0x12c   :  { %v146_v15 = vpack.c.bf16 %v140_v12, %v140_v12  ;;  %145 = vst [vmem:[#allocation5] sm:$0xff] %v140_v12  ;;  %v263_v16 = vpop.f32.mrb[3].mxu0 }
 0x12e   :  { %281 = vmatmul.mubr.bf16.vlgmr.msra.gmra.mrb[0].mxu1 %v146_v15 }
 0x12f   :  { %332 = shalt.err (!%p329_p12)
}
 0x130   :  { %s333_s9 = scalar_lea.hbm %s448_s3, 128 }
 0x131   :  { %p334_p13 = scmp.ne.s32.totalorder %s448_s3, %s333_s9  ;;  %p337_p0 = scmp.lt.u32.totalorder %s333_s9, %s448_s3 }
 0x133   :  { %p339_p1 = pnand %p337_p0, %p334_p13 }
 0x135   :  { %342 = shalt.err (!%p339_p1)
}
 0x136   :  { %197 = dma.vmem_to_hbm [thread:$0]  %s195_s7, 128, %s448_s3, [#allocation4]  }
 0x137   :  { %s377_s16 = smov [#allocation6]  }
 0x138   :  { %s204_s17 = sshll.u32 %s377_s16, 4  ;;  %s205_s17 = int_to_ptr.vmem [resolvable:$true] %s204_s17 }
 0x139   :  { %s343_s18 = scalar_lea.vmem %s205_s17, 128  ;;  %p348_p3 = scmp.lt.s32.totalorder %s205_s17, %s205_s17 }
 0x13a   :  { %p344_p2 = scmp.ne.s32.totalorder %s205_s17, %s343_s18  ;;  %p349_p4 = scmp.lt.s32.totalorder %s343_s18, %s343_s18 }
 0x13c   :  { %p350_p5 = por %p349_p4, %p348_p3 }
 0x13e   :  { %p351_p6 = pnand %p350_p5, %p344_p2 }
 0x201   :  { %v181_v17 = vpop.f32.mrb[0].mxu1 }
 0x202   :  { %187 = vst [vmem:[#allocation6] sm:$0xff] %v181_v17  ;;  %v282_v18 = vpop.f32.mrb[1].mxu1 }
 0x203   :  { %v184_v19 = vpop.f32.mrb[2].mxu1 }
 0x204   :  { %354 = shalt.err (!%p351_p6)
}
 0x205   :  { %s355_s21 = scalar_lea.hbm %s449_s4, 128 }
 0x206   :  { %p356_p7 = scmp.ne.s32.totalorder %s449_s4, %s355_s21  ;;  %p359_p8 = scmp.lt.u32.totalorder %s355_s21, %s449_s4 }
 0x208   :  { %p361_p9 = pnand %p359_p8, %p356_p7 }
 0x20a   :  { %364 = shalt.err (!%p361_p9)
}
 0x20b   :  { %207 = dma.vmem_to_hbm [thread:$0]  %s205_s17, 128, %s449_s4, [#allocation7]   ;;  %v283_v20 = vpop.f32.mrb[3].mxu1 }
 0x20c   :  { %367 = dma.done.wait [#allocation4], 128  }
 0x20d   :  { %368 = vsyncadd [#allocation4], 4294967168 }
 0x20e   :  { %369 = dma.done.wait [#allocation7], 128  }
 0x20f   :  { %370 = vsyncadd [#allocation7], 4294967168 }
 0x210   :  { %214 = vsyncpa [#allocation3], 1 }
 0x211   :  { %215 = vsyncpa [#allocation4], 1 }
 0x212   :  { %216 = vsyncpa [#allocation7], 1 }

</bundles_post_ra>
